<compile_context>
chip_gen: v5e
topology: v5e:2x2
jax: 0.10.0
libtpu: 0.0.40
codegen_flags: <defaults>
</compile_context>

<pallas_src>
import functools

import jax
import jax.numpy as jnp
from jax.experimental import pallas as pl
from jax.experimental.pallas import tpu as pltpu

BN_EPS = 1e-5
LANE = 128
VMEM_LIMIT = 64 * 1024 * 1024


def _round_up(x, m):
    return ((x + m - 1) // m) * m


# ---------------------------------------------------------------------------
# Pass 1: conv-as-matmul (bf16 in, f32 acc) + per-tile channel statistics.
# ---------------------------------------------------------------------------
def _matmul_stats_kernel(p_ref, w_ref, y_ref, stats_ref):
    # p_ref : (TILE_M, K_pad)   bf16 im2col patches
    # w_ref : (K_pad, C_pad)    bf16 conv weight
    # y_ref : (TILE_M, C_pad)   f32 pre-BN conv output
    # stats_ref : (2, C_pad)    f32 per-tile [sum, sum_sq]
    y = jnp.dot(p_ref[...], w_ref[...], preferred_element_type=jnp.float32)
    y_ref[...] = y
    s1 = jnp.sum(y, axis=0, keepdims=True)        # (1, C_pad)
    s2 = jnp.sum(y * y, axis=0, keepdims=True)    # (1, C_pad)
    stats_ref[...] = jnp.concatenate([s1, s2], axis=0)


# ---------------------------------------------------------------------------
# Pass 2: folded BatchNorm (single per-channel FMA) + ReLU.
# ---------------------------------------------------------------------------
def _bn_relu_kernel(y_ref, scale_ref, shift_ref, o_ref):
    z = y_ref[...] * scale_ref[...] + shift_ref[...]
    o_ref[...] = jnp.maximum(z, 0.0)


def conv_bn_relu(x_nchw, weight, bias, gamma, beta, *, stride=1, padding=0,
                 tile_m=512):
    """x_nchw: (N, C_in, H, W); weight: (C_out, C_in, KH, KW)."""
    del bias  # conv bias cancels exactly under training-mode BatchNorm (mean subtraction)

    N, C_in, H, W = x_nchw.shape
    C_out, _, KH, KW = weight.shape

    # NHWC (channels-last -> channels map to lanes).
    x = jnp.transpose(x_nchw, (0, 2, 3, 1))
    if padding > 0:
        x = jnp.pad(x, ((0, 0), (padding, padding), (padding, padding), (0, 0)))
    Hp, Wp = H + 2 * padding, W + 2 * padding
    OH = (Hp - KH) // stride + 1
    OW = (Wp - KW) // stride + 1

    # Channels-last im2col (glue): strided slices + stack + reshape, no big transpose.
    slices = [x[:, kh:kh + stride * OH:stride, kw:kw + stride * OW:stride, :]
              for kh in range(KH) for kw in range(KW)]
    patches = jnp.stack(slices, axis=3)                      # (N, OH, OW, KH*KW, C_in)
    M = N * OH * OW
    K = KH * KW * C_in
    patches = patches.reshape(M, K)

    # Pad to MXU/lane-friendly shapes.
    K_pad = _round_up(K, LANE)
    C_pad = _round_up(C_out, LANE)
    TILE_M = min(tile_m, _round_up(M, 8))
    M_pad = _round_up(M, TILE_M)
    num_tiles = M_pad // TILE_M

    patches = jnp.pad(patches, ((0, M_pad - M), (0, K_pad - K))).astype(jnp.bfloat16)

    # (C_out, C_in, KH, KW) -> (KH, KW, C_in, C_out) -> (K, C_out), zero-padded, bf16.
    w_mat = jnp.transpose(weight, (2, 3, 1, 0)).reshape(K, C_out)
    w_mat = jnp.pad(w_mat, ((0, K_pad - K), (0, C_pad - C_out))).astype(jnp.bfloat16)

    compiler_params = pltpu.CompilerParams(
        dimension_semantics=("parallel",),
        vmem_limit_bytes=VMEM_LIMIT,
    )

    # ---- Pass 1: matmul + per-tile stats -------------------------------------------------
    cost = pl.CostEstimate(
        flops=2 * M_pad * K_pad * C_pad,
        transcendentals=0,
        bytes_accessed=(M_pad * K_pad * 2 + K_pad * C_pad * 2
                        + M_pad * C_pad * 4 + num_tiles * 2 * C_pad * 4),
    )
    y_flat, stats = pl.pallas_call(
        _matmul_stats_kernel,
        out_shape=(
            jax.ShapeDtypeStruct((M_pad, C_pad), jnp.float32),
            jax.ShapeDtypeStruct((num_tiles, 2, C_pad), jnp.float32),
        ),
        grid=(num_tiles,),
        in_specs=[
            pl.BlockSpec((TILE_M, K_pad), lambda i: (i, 0)),
            pl.BlockSpec((K_pad, C_pad), lambda i: (0, 0)),
        ],
        out_specs=(
            pl.BlockSpec((TILE_M, C_pad), lambda i: (i, 0)),
            pl.BlockSpec((None, 2, C_pad), lambda i: (i, 0, 0)),
        ),
        compiler_params=compiler_params,
        cost_estimate=cost,
    )(patches, w_mat)

    # ---- Tiny (C,) glue: combine partial stats, fold BN into scale/shift -----------------
    s1 = jnp.sum(stats[:, 0, :], axis=0)
    s2 = jnp.sum(stats[:, 1, :], axis=0)
    inv_m = 1.0 / float(M)
    mean = s1 * inv_m
    var = jnp.maximum(s2 * inv_m - mean * mean, 0.0)          # biased var, clamp cancellation
    gamma_pad = jnp.pad(gamma.astype(jnp.float32), (0, C_pad - C_out))
    beta_pad = jnp.pad(beta.astype(jnp.float32), (0, C_pad - C_out))
    scale = (gamma_pad * jax.lax.rsqrt(var + BN_EPS)).reshape(1, C_pad)
    shift = (beta_pad - mean * gamma_pad * jax.lax.rsqrt(var + BN_EPS)).reshape(1, C_pad)

    # ---- Pass 2: per-channel FMA + ReLU, in place ----------------------------------------
    out_flat = pl.pallas_call(
        _bn_relu_kernel,
        out_shape=jax.ShapeDtypeStruct((M_pad, C_pad), jnp.float32),
        grid=(num_tiles,),
        in_specs=[
            pl.BlockSpec((TILE_M, C_pad), lambda i: (i, 0)),
            pl.BlockSpec((1, C_pad), lambda i: (0, 0)),
            pl.BlockSpec((1, C_pad), lambda i: (0, 0)),
        ],
        out_specs=pl.BlockSpec((TILE_M, C_pad), lambda i: (i, 0)),
        input_output_aliases={0: 0},
        compiler_params=compiler_params,
    )(y_flat, scale, shift)

    # (M_pad, C_pad) -> (N, OH, OW, C_out) -> NCHW
    out = out_flat[:M, :C_out].reshape(N, OH, OW, C_out).transpose(0, 3, 1, 2)
    return out


def _reference(x, w, b, g, bta, *, stride=1, padding=0):
    y = jax.lax.conv_general_dilated(
        x, w, window_strides=(stride, stride),
        padding=[(padding, padding), (padding, padding)],
        dimension_numbers=("NCHW", "OIHW", "NCHW"))
    y = y + b[None, :, None, None]
    mean = y.mean(axis=(0, 2, 3), keepdims=True)
    var = y.var(axis=(0, 2, 3), keepdims=True)
    yh = (y - mean) * jax.lax.rsqrt(var + BN_EPS)
    z = yh * g[None, :, None, None] + bta[None, :, None, None]
    return jnp.maximum(z, 0.0)


if __name__ == "__main__":
    # Small shapes consistent with the module defaults (kernel_size=3, stride=1, padding=0).
    N, C_in, H, W = 2, 4, 16, 16
    C_out, KH, KW = 8, 3, 3

    key = jax.random.PRNGKey(0)
    k_x, k_w = jax.random.split(key)

    x = jax.random.normal(k_x, (N, C_in, H, W), dtype=jnp.float32)

    # Deterministic parameter init mirroring the module's __init__:
    #   conv.weight ~ xavier_normal_, conv.bias = 0, bn.weight = 1, bn.bias = 0.
    fan_in = C_in * KH * KW
    fan_out = C_out * KH * KW
    xavier_std = (2.0 / (fan_in + fan_out)) ** 0.5
    weight = xavier_std * jax.random.normal(k_w, (C_out, C_in, KH, KW), dtype=jnp.float32)
    bias = jnp.zeros((C_out,), dtype=jnp.float32)
    gamma = jnp.ones((C_out,), dtype=jnp.float32)
    beta = jnp.zeros((C_out,), dtype=jnp.float32)

    fwd = jax.jit(functools.partial(conv_bn_relu, stride=1, padding=0))
    out = fwd(x, weight, bias, gamma, beta)
    jax.block_until_ready(out)

    assert out.shape == (N, C_out, H - KH + 1, W - KW + 1), out.shape

    # Correctness check against a pure-JAX f32 reference (bf16 matmul => loose tolerance).
    ref = _reference(x, weight, bias, gamma, beta, stride=1, padding=0)
    max_err = float(jnp.max(jnp.abs(out - ref)))
    assert max_err < 1e-1, f"max abs err vs reference: {max_err}"

    print("KERNEL_OK")
</pallas_src>

<mosaic_0001>
module attributes {stable_mosaic.version = 11 : i64} {
  func.func @_matmul_stats_kernel(%arg0: i32, %arg1: memref<392x128xbf16, #tpu.memory_space<vmem>>, %arg2: memref<128x128xbf16, #tpu.memory_space<vmem>>, %arg3: memref<392x128xf32, #tpu.memory_space<vmem>>, %arg4: memref<1x2x128xf32, #tpu.memory_space<vmem>>) attributes {dimension_semantics = [#tpu.dimension_semantics<parallel>], iteration_bounds = array<i64: 1>, scalar_prefetch = 0 : i64, scratch_operands = 0 : i64, tpu.core_type = #tpu.core_type<tc>, window_params = [{transform_indices = @transform_0, window_bounds = array<i64: 392, 128>}, {pipeline_mode = #tpu.pipeline_mode<synchronous>, transform_indices = @transform_1, window_bounds = array<i64: 128, 128>}, {transform_indices = @transform_2, window_bounds = array<i64: 392, 128>}, {transform_indices = @transform_3, window_bounds = array<i64: 1, 2, 128>}]} {
    %c0 = arith.constant 0 : index
    %c0_0 = arith.constant 0 : index
    %0 = vector.load %arg1[%c0, %c0_0] : memref<392x128xbf16, #tpu.memory_space<vmem>>, vector<392x128xbf16>
    %c0_1 = arith.constant 0 : index
    %c0_2 = arith.constant 0 : index
    %1 = vector.load %arg2[%c0_1, %c0_2] : memref<128x128xbf16, #tpu.memory_space<vmem>>, vector<128x128xbf16>
    %cst = arith.constant dense<0.000000e+00> : vector<392x128xf32>
    %2 = tpu.matmul %0, %1, %cst {dimension_numbers = #tpu.dot_dimension_numbers<[1], [0], [0], [1], [0, 0, 1, 1], [], []>} : vector<392x128xbf16>, vector<128x128xbf16>, vector<392x128xf32> -> vector<392x128xf32>
    %c0_3 = arith.constant 0 : index
    %c0_4 = arith.constant 0 : index
    %3 = vector.load %arg3[%c0_3, %c0_4] : memref<392x128xf32, #tpu.memory_space<vmem>>, vector<392x128xf32>
    tpu.vector_store %arg3[%c0_3, %c0_4], %2 {strides = array<i32>} : memref<392x128xf32, #tpu.memory_space<vmem>>, vector<392x128xf32>,
    %cst_5 = arith.constant dense<0.000000e+00> : vector<128xf32>
    %4 = vector.multi_reduction <add>, %2, %cst_5 [0] : vector<392x128xf32> to vector<128xf32>
    %5 = vector.shape_cast %4 : vector<128xf32> to vector<1x128xf32>
    %6 = arith.mulf %2, %2 : vector<392x128xf32>
    %cst_6 = arith.constant dense<0.000000e+00> : vector<128xf32>
    %7 = vector.multi_reduction <add>, %6, %cst_6 [0] : vector<392x128xf32> to vector<128xf32>
    %8 = vector.shape_cast %7 : vector<128xf32> to vector<1x128xf32>
    %9 = tpu.concatenate %5, %8 in 0 : vector<1x128xf32>, vector<1x128xf32> -> vector<2x128xf32>
    %c0_7 = arith.constant 0 : index
    %c0_8 = arith.constant 0 : index
    %c0_9 = arith.constant 0 : index
    %10 = vector.load %arg4[%c0_7, %c0_8, %c0_9] : memref<1x2x128xf32, #tpu.memory_space<vmem>>, vector<1x2x128xf32>
    %11 = vector.shape_cast %10 : vector<1x2x128xf32> to vector<2x128xf32>
    %12 = vector.shape_cast %9 : vector<2x128xf32> to vector<1x2x128xf32>
    tpu.vector_store %arg4[%c0_7, %c0_8, %c0_9], %12 {strides = array<i32>} : memref<1x2x128xf32, #tpu.memory_space<vmem>>, vector<1x2x128xf32>,
    return
  }
  func.func @transform_0(%arg0: i32) -> (i32, i32) {
    %c0_i32 = arith.constant 0 : i32
    %c0_i32_0 = arith.constant 0 : i32
    return %arg0, %c0_i32 : i32, i32
  }
  func.func @transform_1(%arg0: i32) -> (i32, i32) {
    %c0_i32 = arith.constant 0 : i32
    %c0_i32_0 = arith.constant 0 : i32
    %c0_i32_1 = arith.constant 0 : i32
    return %c0_i32, %c0_i32_0 : i32, i32
  }
  func.func @transform_2(%arg0: i32) -> (i32, i32) {
    %c0_i32 = arith.constant 0 : i32
    %c0_i32_0 = arith.constant 0 : i32
    return %arg0, %c0_i32 : i32, i32
  }
  func.func @transform_3(%arg0: i32) -> (i32, i32, i32) {
    %c0_i32 = arith.constant 0 : i32
    %c0_i32_0 = arith.constant 0 : i32
    %c0_i32_1 = arith.constant 0 : i32
    return %arg0, %c0_i32, %c0_i32_0 : i32, i32, i32
  }
}

module attributes {stable_mosaic.version = 11 : i64} {
  func.func @_bn_relu_kernel(%arg0: i32, %arg1: memref<392x128xf32, #tpu.memory_space<vmem>>, %arg2: memref<1x128xf32, #tpu.memory_space<vmem>>, %arg3: memref<1x128xf32, #tpu.memory_space<vmem>>, %arg4: memref<392x128xf32, #tpu.memory_space<vmem>>) attributes {dimension_semantics = [#tpu.dimension_semantics<parallel>], iteration_bounds = array<i64: 1>, scalar_prefetch = 0 : i64, scratch_operands = 0 : i64, tpu.core_type = #tpu.core_type<tc>, window_params = [{transform_indices = @transform_0, window_bounds = array<i64: 392, 128>}, {pipeline_mode = #tpu.pipeline_mode<synchronous>, transform_indices = @transform_1, window_bounds = array<i64: 1, 128>}, {pipeline_mode = #tpu.pipeline_mode<synchronous>, transform_indices = @transform_2, window_bounds = array<i64: 1, 128>}, {transform_indices = @transform_3, window_bounds = array<i64: 392, 128>}]} {
    %c0 = arith.constant 0 : index
    %c0_0 = arith.constant 0 : index
    %0 = vector.load %arg1[%c0, %c0_0] : memref<392x128xf32, #tpu.memory_space<vmem>>, vector<392x128xf32>
    %c0_1 = arith.constant 0 : index
    %c0_2 = arith.constant 0 : index
    %1 = vector.load %arg2[%c0_1, %c0_2] : memref<1x128xf32, #tpu.memory_space<vmem>>, vector<1x128xf32>
    %2 = vector.broadcast %1 : vector<1x128xf32> to vector<392x128xf32>
    %3 = arith.mulf %0, %2 : vector<392x128xf32>
    %c0_3 = arith.constant 0 : index
    %c0_4 = arith.constant 0 : index
    %4 = vector.load %arg3[%c0_3, %c0_4] : memref<1x128xf32, #tpu.memory_space<vmem>>, vector<1x128xf32>
    %5 = vector.broadcast %4 : vector<1x128xf32> to vector<392x128xf32>
    %6 = arith.addf %3, %5 : vector<392x128xf32>
    %cst = arith.constant 0.000000e+00 : f32
    %7 = vector.broadcast %cst : f32 to vector<392x128xf32>
    %8 = arith.maximumf %6, %7 : vector<392x128xf32>
    %c0_5 = arith.constant 0 : index
    %c0_6 = arith.constant 0 : index
    %9 = vector.load %arg4[%c0_5, %c0_6] : memref<392x128xf32, #tpu.memory_space<vmem>>, vector<392x128xf32>
    tpu.vector_store %arg4[%c0_5, %c0_6], %8 {strides = array<i32>} : memref<392x128xf32, #tpu.memory_space<vmem>>, vector<392x128xf32>,
    return
  }
  func.func @transform_0(%arg0: i32) -> (i32, i32) {
    %c0_i32 = arith.constant 0 : i32
    %c0_i32_0 = arith.constant 0 : i32
    return %arg0, %c0_i32 : i32, i32
  }
  func.func @transform_1(%arg0: i32) -> (i32, i32) {
    %c0_i32 = arith.constant 0 : i32
    %c0_i32_0 = arith.constant 0 : i32
    %c0_i32_1 = arith.constant 0 : i32
    return %c0_i32, %c0_i32_0 : i32, i32
  }
  func.func @transform_2(%arg0: i32) -> (i32, i32) {
    %c0_i32 = arith.constant 0 : i32
    %c0_i32_0 = arith.constant 0 : i32
    %c0_i32_1 = arith.constant 0 : i32
    return %c0_i32, %c0_i32_0 : i32, i32
  }
  func.func @transform_3(%arg0: i32) -> (i32, i32) {
    %c0_i32 = arith.constant 0 : i32
    %c0_i32_0 = arith.constant 0 : i32
    return %arg0, %c0_i32 : i32, i32
  }
}

</mosaic_0001>

<bundles_post_ra>
// kernel: conv_bn_relu.3
= control target key start
LH: loop header
LB: loop body
LE: loop exit
PB: predicated region body
PF: predicated region fallthrough
CT: control target
= control target key end

     0   :  { %s695_s0 = inlined_call_operand.vmem [shape: f32[392,128], index: 0, kind: input, shape index: {}, may-alias: {0,3}]   ;;  %s696_s1 = inlined_call_operand.vmem [shape: f32[1,128], index: 1, kind: input, shape index: {}]   ;;  %s697_s2 = inlined_call_operand.vmem [shape: f32[1,128], index: 2, kind: input, shape index: {}]   ;;  %s698_s3 = inlined_call_operand.vmem [shape: f32[392,128], index: 3, kind: output, shape index: {}, may-alias: {0,3}]  }
   0x1   :  { %v14_v0 = vld [vmem:[%s695_s0] sm:$0xff]  ;;  %v15_v3 = vld [vmem:[%s695_s0 + $0x8] sm:$0xff]  ;;  %v16_v6 = vld [vmem:[%s695_s0 + $0x10] sm:$0xff] }
   0x2   :  { %v299_v1 = vld [vmem:[%s696_s1] ss:$0 sm:$0xff]  ;;  %v17_v7 = vld [vmem:[%s695_s0 + $0x18] sm:$0xff]  ;;  %v19_v12 = vld [vmem:[%s695_s0 + $0x28] sm:$0xff] }
   0x3   :  { %v304_v2 = vld [vmem:[%s697_s2] ss:$0 sm:$0xff]  ;;  %v67_v4 = vmul.f32 %v299_v1, %v14_v0  ;;  %v68_v5 = vmul.f32 %v299_v1, %v15_v3  ;;  %v69_v9 = vmul.f32 %v299_v1, %v16_v6  ;;  %v70_v10 = vmul.f32 %v299_v1, %v17_v7  ;;  %v20_v13 = vld [vmem:[%s695_s0 + $0x30] sm:$0xff]  ;;  %v21_v14 = vld [vmem:[%s695_s0 + $0x38] sm:$0xff] }
   0x4   :  { %v18_v8 = vld [vmem:[%s695_s0 + $0x20] sm:$0xff]  ;;  %v72_v17 = vmul.f32 %v299_v1, %v19_v12  ;;  %v73_v18 = vmul.f32 %v299_v1, %v20_v13  ;;  %v74_v22 = vmul.f32 %v299_v1, %v21_v14  ;;  %v23_v24 = vld [vmem:[%s695_s0 + $0x48] sm:$0xff]  ;;  %v24_v29 = vld [vmem:[%s695_s0 + $0x50] sm:$0xff] }
   0x5   :  { %v71_v11 = vmul.f32 %v299_v1, %v18_v8  ;;  %v120_v15 = vadd.f32 %v304_v2, %v67_v4  ;;  %v121_v16 = vadd.f32 %v304_v2, %v68_v5  ;;  %v122_v19 = vadd.f32 %v304_v2, %v69_v9  ;;  %v22_v23 = vld [vmem:[%s695_s0 + $0x40] sm:$0xff]  ;;  %v25_v30 = vld [vmem:[%s695_s0 + $0x58] sm:$0xff]  ;;  %v27_v35 = vld [vmem:[%s695_s0 + $0x68] sm:$0xff] }
   0x6   :  { %v123_v20 = vadd.f32 %v304_v2, %v70_v10  ;;  %v125_v27 = vadd.f32 %v304_v2, %v72_v17  ;;  %v126_v28 = vadd.f32 %v304_v2, %v73_v18  ;;  %v26_v31 = vld [vmem:[%s695_s0 + $0x60] sm:$0xff]  ;;  %v127_v34 = vadd.f32 %v304_v2, %v74_v22  ;;  %v28_v36 = vld [vmem:[%s695_s0 + $0x70] sm:$0xff] }
   0x7   :  { %v124_v21 = vadd.f32 %v304_v2, %v71_v11  ;;  %v169_v25 = vmax.f32 %v120_v15, 0.0  ;;  %v170_v26 = vmax.f32 %v121_v16, 0.0  ;;  %v171_v32 = vmax.f32 %v122_v19, 0.0 }
   0x8   :  { %v172_v33 = vmax.f32 %v123_v20, 0.0  ;;  %v174_v38 = vmax.f32 %v125_v27, 0.0  ;;  %v75_v39 = vmul.f32 %v299_v1, %v22_v23  ;;  %v76_v40 = vmul.f32 %v299_v1, %v23_v24 }
   0x9   :  { %218 = vst [vmem:[%s698_s3] sm:$0xff] %v169_v25  ;;  %v173_v37 = vmax.f32 %v124_v21, 0.0  ;;  %v175_v42 = vmax.f32 %v126_v28, 0.0  ;;  %v77_v43 = vmul.f32 %v299_v1, %v24_v29  ;;  %v78_v44 = vmul.f32 %v299_v1, %v25_v30 }
   0xa   :  { %v79_v45 = vmul.f32 %v299_v1, %v26_v31  ;;  %v128_v46 = vadd.f32 %v304_v2, %v75_v39  ;;  %v129_v47 = vadd.f32 %v304_v2, %v76_v40  ;;  %v80_v48 = vmul.f32 %v299_v1, %v27_v35 }
   0xb   :  { %v81_v49 = vmul.f32 %v299_v1, %v28_v36  ;;  %v176_v50 = vmax.f32 %v127_v34, 0.0  ;;  %v130_v51 = vadd.f32 %v304_v2, %v77_v43  ;;  %v131_v52 = vadd.f32 %v304_v2, %v78_v44 }
   0xc   :  { %v177_v56 = vmax.f32 %v128_v46, 0.0  ;;  %v132_v57 = vadd.f32 %v304_v2, %v79_v45  ;;  %v178_v60 = vmax.f32 %v129_v47, 0.0  ;;  %v133_v61 = vadd.f32 %v304_v2, %v80_v48 }
   0xd   :  { %v179_v63 = vmax.f32 %v130_v51, 0.0  ;;  %v134_v0 = vadd.f32 %v304_v2, %v81_v49  ;;  %v180_v6 = vmax.f32 %v131_v52, 0.0 }
   0xe   :  { %v181_v11 = vmax.f32 %v132_v57, 0.0  ;;  %v182_v15 = vmax.f32 %v133_v61, 0.0 }
   0xf   :  { %v183_v19 = vmax.f32 %v134_v0, 0.0 }
  0x10   :  { %v29_v41 = vld [vmem:[%s695_s0 + $0x78] sm:$0xff] }
  0x11   :  { %219 = vst [vmem:[%s698_s3 + $0x8] sm:$0xff] %v170_v26  ;;  %v82_v53 = vmul.f32 %v299_v1, %v29_v41 }
  0x12   :  { %220 = vst [vmem:[%s698_s3 + $0x10] sm:$0xff] %v171_v32 }
  0x13   :  { %221 = vst [vmem:[%s698_s3 + $0x18] sm:$0xff] %v172_v33  ;;  %v135_v7 = vadd.f32 %v304_v2, %v82_v53 }
  0x15   :  { %v184_v23 = vmax.f32 %v135_v7, 0.0 }
  0x1a   :  { %v30_v54 = vld [vmem:[%s695_s0 + $0x80] sm:$0xff]  ;;  %v31_v55 = vld [vmem:[%s695_s0 + $0x88] sm:$0xff] }
  0x1b   :  { %222 = vst [vmem:[%s698_s3 + $0x20] sm:$0xff] %v173_v37  ;;  %v83_v3 = vmul.f32 %v299_v1, %v30_v54  ;;  %v84_v4 = vmul.f32 %v299_v1, %v31_v55 }
  0x1d   :  { %v136_v12 = vadd.f32 %v304_v2, %v83_v3  ;;  %v137_v16 = vadd.f32 %v304_v2, %v84_v4 }
  0x1f   :  { %v185_v27 = vmax.f32 %v136_v12, 0.0  ;;  %v186_v31 = vmax.f32 %v137_v16, 0.0 }
  0x22   :  { %v32_v58 = vld [vmem:[%s695_s0 + $0x90] sm:$0xff]  ;;  %v33_v59 = vld [vmem:[%s695_s0 + $0x98] sm:$0xff] }
  0x23   :  { %223 = vst [vmem:[%s698_s3 + $0x28] sm:$0xff] %v174_v38  ;;  %v85_v8 = vmul.f32 %v299_v1, %v32_v58  ;;  %v86_v9 = vmul.f32 %v299_v1, %v33_v59 }
  0x25   :  { %v138_v20 = vadd.f32 %v304_v2, %v85_v8  ;;  %v139_v24 = vadd.f32 %v304_v2, %v86_v9 }
  0x27   :  { %v187_v35 = vmax.f32 %v138_v20, 0.0  ;;  %v188_v39 = vmax.f32 %v139_v24, 0.0 }
  0x2a   :  { %v34_v62 = vld [vmem:[%s695_s0 + $0xa0] sm:$0xff] }
  0x2b   :  { %224 = vst [vmem:[%s698_s3 + $0x30] sm:$0xff] %v175_v42  ;;  %v87_v13 = vmul.f32 %v299_v1, %v34_v62 }
  0x2d   :  { %v140_v28 = vadd.f32 %v304_v2, %v87_v13 }
  0x2f   :  { %v189_v43 = vmax.f32 %v140_v28, 0.0 }
  0x32   :  { %v35_v5 = vld [vmem:[%s695_s0 + $0xa8] sm:$0xff] }
  0x33   :  { %225 = vst [vmem:[%s698_s3 + $0x38] sm:$0xff] %v176_v50  ;;  %v88_v17 = vmul.f32 %v299_v1, %v35_v5 }
  0x35   :  { %v141_v32 = vadd.f32 %v304_v2, %v88_v17 }
  0x37   :  { %v190_v47 = vmax.f32 %v141_v32, 0.0 }
  0x3a   :  { %v36_v10 = vld [vmem:[%s695_s0 + $0xb0] sm:$0xff] }
  0x3b   :  { %226 = vst [vmem:[%s698_s3 + $0x40] sm:$0xff] %v177_v56  ;;  %v89_v21 = vmul.f32 %v299_v1, %v36_v10 }
  0x3d   :  { %v142_v36 = vadd.f32 %v304_v2, %v89_v21 }
  0x3f   :  { %v191_v51 = vmax.f32 %v142_v36, 0.0 }
  0x42   :  { %v37_v14 = vld [vmem:[%s695_s0 + $0xb8] sm:$0xff] }
  0x43   :  { %227 = vst [vmem:[%s698_s3 + $0x48] sm:$0xff] %v178_v60  ;;  %v90_v25 = vmul.f32 %v299_v1, %v37_v14 }
  0x45   :  { %v143_v40 = vadd.f32 %v304_v2, %v90_v25 }
  0x47   :  { %v192_v55 = vmax.f32 %v143_v40, 0.0 }
  0x4a   :  { %v38_v18 = vld [vmem:[%s695_s0 + $0xc0] sm:$0xff] }
  0x4b   :  { %228 = vst [vmem:[%s698_s3 + $0x50] sm:$0xff] %v179_v63  ;;  %v91_v29 = vmul.f32 %v299_v1, %v38_v18 }
  0x4d   :  { %v144_v44 = vadd.f32 %v304_v2, %v91_v29 }
  0x4f   :  { %v193_v59 = vmax.f32 %v144_v44, 0.0 }
  0x52   :  { %v39_v22 = vld [vmem:[%s695_s0 + $0xc8] sm:$0xff] }
  0x53   :  { %229 = vst [vmem:[%s698_s3 + $0x58] sm:$0xff] %v180_v6  ;;  %v92_v33 = vmul.f32 %v299_v1, %v39_v22 }
  0x55   :  { %v145_v48 = vadd.f32 %v304_v2, %v92_v33 }
  0x57   :  { %v194_v63 = vmax.f32 %v145_v48, 0.0 }
  0x5a   :  { %v40_v26 = vld [vmem:[%s695_s0 + $0xd0] sm:$0xff] }
  0x5b   :  { %230 = vst [vmem:[%s698_s3 + $0x60] sm:$0xff] %v181_v11  ;;  %v93_v37 = vmul.f32 %v299_v1, %v40_v26 }
  0x5d   :  { %v146_v52 = vadd.f32 %v304_v2, %v93_v37 }
  0x5f   :  { %v195_v5 = vmax.f32 %v146_v52, 0.0 }
  0x62   :  { %v41_v30 = vld [vmem:[%s695_s0 + $0xd8] sm:$0xff] }
  0x63   :  { %231 = vst [vmem:[%s698_s3 + $0x68] sm:$0xff] %v182_v15  ;;  %v94_v41 = vmul.f32 %v299_v1, %v41_v30 }
  0x65   :  { %v147_v56 = vadd.f32 %v304_v2, %v94_v41 }
  0x67   :  { %v196_v9 = vmax.f32 %v147_v56, 0.0 }
  0x6a   :  { %v42_v34 = vld [vmem:[%s695_s0 + $0xe0] sm:$0xff] }
  0x6b   :  { %232 = vst [vmem:[%s698_s3 + $0x70] sm:$0xff] %v183_v19  ;;  %v95_v45 = vmul.f32 %v299_v1, %v42_v34 }
  0x6d   :  { %v148_v60 = vadd.f32 %v304_v2, %v95_v45 }
  0x6f   :  { %v197_v13 = vmax.f32 %v148_v60, 0.0 }
  0x72   :  { %v43_v38 = vld [vmem:[%s695_s0 + $0xe8] sm:$0xff] }
  0x73   :  { %233 = vst [vmem:[%s698_s3 + $0x78] sm:$0xff] %v184_v23  ;;  %v96_v49 = vmul.f32 %v299_v1, %v43_v38 }
  0x75   :  { %v149_v0 = vadd.f32 %v304_v2, %v96_v49 }
  0x77   :  { %v198_v17 = vmax.f32 %v149_v0, 0.0 }
  0x7a   :  { %v44_v42 = vld [vmem:[%s695_s0 + $0xf0] sm:$0xff] }
  0x7b   :  { %234 = vst [vmem:[%s698_s3 + $0x80] sm:$0xff] %v185_v27  ;;  %v97_v53 = vmul.f32 %v299_v1, %v44_v42 }
  0x7d   :  { %v150_v6 = vadd.f32 %v304_v2, %v97_v53 }
  0x7f   :  { %v199_v21 = vmax.f32 %v150_v6, 0.0 }
  0x82   :  { %v45_v46 = vld [vmem:[%s695_s0 + $0xf8] sm:$0xff] }
  0x83   :  { %235 = vst [vmem:[%s698_s3 + $0x88] sm:$0xff] %v186_v31  ;;  %v98_v57 = vmul.f32 %v299_v1, %v45_v46 }
  0x85   :  { %v151_v10 = vadd.f32 %v304_v2, %v98_v57 }
  0x87   :  { %v200_v25 = vmax.f32 %v151_v10, 0.0 }
  0x8a   :  { %v46_v50 = vld [vmem:[%s695_s0 + $0x100] sm:$0xff] }
  0x8b   :  { %236 = vst [vmem:[%s698_s3 + $0x90] sm:$0xff] %v187_v35  ;;  %v99_v61 = vmul.f32 %v299_v1, %v46_v50 }
  0x8d   :  { %v152_v14 = vadd.f32 %v304_v2, %v99_v61 }
  0x8f   :  { %v201_v29 = vmax.f32 %v152_v14, 0.0 }
  0x92   :  { %v47_v54 = vld [vmem:[%s695_s0 + $0x108] sm:$0xff] }
  0x93   :  { %237 = vst [vmem:[%s698_s3 + $0x98] sm:$0xff] %v188_v39  ;;  %v100_v3 = vmul.f32 %v299_v1, %v47_v54 }
  0x95   :  { %v153_v18 = vadd.f32 %v304_v2, %v100_v3 }
  0x97   :  { %v202_v33 = vmax.f32 %v153_v18, 0.0 }
  0x9a   :  { %v48_v58 = vld [vmem:[%s695_s0 + $0x110] sm:$0xff] }
  0x9b   :  { %238 = vst [vmem:[%s698_s3 + $0xa0] sm:$0xff] %v189_v43  ;;  %v101_v7 = vmul.f32 %v299_v1, %v48_v58 }
  0x9d   :  { %v154_v22 = vadd.f32 %v304_v2, %v101_v7 }
  0x9f   :  { %v203_v37 = vmax.f32 %v154_v22, 0.0 }
  0xa2   :  { %v49_v62 = vld [vmem:[%s695_s0 + $0x118] sm:$0xff] }
  0xa3   :  { %239 = vst [vmem:[%s698_s3 + $0xa8] sm:$0xff] %v190_v47  ;;  %v102_v11 = vmul.f32 %v299_v1, %v49_v62 }
  0xa5   :  { %v155_v26 = vadd.f32 %v304_v2, %v102_v11 }
  0xa7   :  { %v204_v41 = vmax.f32 %v155_v26, 0.0 }
  0xaa   :  { %v50_v4 = vld [vmem:[%s695_s0 + $0x120] sm:$0xff] }
  0xab   :  { %240 = vst [vmem:[%s698_s3 + $0xb0] sm:$0xff] %v191_v51  ;;  %v103_v15 = vmul.f32 %v299_v1, %v50_v4 }
  0xad   :  { %v156_v30 = vadd.f32 %v304_v2, %v103_v15 }
  0xaf   :  { %v205_v45 = vmax.f32 %v156_v30, 0.0 }
  0xb2   :  { %v51_v8 = vld [vmem:[%s695_s0 + $0x128] sm:$0xff] }
  0xb3   :  { %241 = vst [vmem:[%s698_s3 + $0xb8] sm:$0xff] %v192_v55  ;;  %v104_v19 = vmul.f32 %v299_v1, %v51_v8 }
  0xb5   :  { %v157_v34 = vadd.f32 %v304_v2, %v104_v19 }
  0xb7   :  { %v206_v49 = vmax.f32 %v157_v34, 0.0 }
  0xba   :  { %v52_v12 = vld [vmem:[%s695_s0 + $0x130] sm:$0xff] }
  0xbb   :  { %242 = vst [vmem:[%s698_s3 + $0xc0] sm:$0xff] %v193_v59  ;;  %v105_v23 = vmul.f32 %v299_v1, %v52_v12 }
  0xbd   :  { %v158_v38 = vadd.f32 %v304_v2, %v105_v23 }
  0xbf   :  { %v207_v53 = vmax.f32 %v158_v38, 0.0 }
  0xc2   :  { %v53_v16 = vld [vmem:[%s695_s0 + $0x138] sm:$0xff] }
  0xc3   :  { %243 = vst [vmem:[%s698_s3 + $0xc8] sm:$0xff] %v194_v63  ;;  %v106_v27 = vmul.f32 %v299_v1, %v53_v16 }
  0xc5   :  { %v159_v42 = vadd.f32 %v304_v2, %v106_v27 }
  0xc7   :  { %v208_v56 = vmax.f32 %v159_v42, 0.0 }
  0xca   :  { %v54_v20 = vld [vmem:[%s695_s0 + $0x140] sm:$0xff] }
  0xcb   :  { %244 = vst [vmem:[%s698_s3 + $0xd0] sm:$0xff] %v195_v5  ;;  %v107_v31 = vmul.f32 %v299_v1, %v54_v20 }
  0xcd   :  { %v160_v46 = vadd.f32 %v304_v2, %v107_v31 }
  0xcf   :  { %v209_v59 = vmax.f32 %v160_v46, 0.0 }
  0xd2   :  { %v55_v24 = vld [vmem:[%s695_s0 + $0x148] sm:$0xff] }
  0xd3   :  { %245 = vst [vmem:[%s698_s3 + $0xd8] sm:$0xff] %v196_v9  ;;  %v108_v35 = vmul.f32 %v299_v1, %v55_v24 }
  0xd5   :  { %v161_v50 = vadd.f32 %v304_v2, %v108_v35 }
  0xd7   :  { %v210_v62 = vmax.f32 %v161_v50, 0.0 }
  0xda   :  { %v56_v28 = vld [vmem:[%s695_s0 + $0x150] sm:$0xff] }
  0xdb   :  { %246 = vst [vmem:[%s698_s3 + $0xe0] sm:$0xff] %v197_v13  ;;  %v109_v39 = vmul.f32 %v299_v1, %v56_v28 }
  0xdd   :  { %v162_v54 = vadd.f32 %v304_v2, %v109_v39 }
  0xdf   :  { %v211_v0 = vmax.f32 %v162_v54, 0.0 }
  0xe2   :  { %v57_v32 = vld [vmem:[%s695_s0 + $0x158] sm:$0xff] }
  0xe3   :  { %247 = vst [vmem:[%s698_s3 + $0xe8] sm:$0xff] %v198_v17  ;;  %v110_v43 = vmul.f32 %v299_v1, %v57_v32 }
  0xe5   :  { %v163_v57 = vadd.f32 %v304_v2, %v110_v43 }
  0xe7   :  { %v212_v4 = vmax.f32 %v163_v57, 0.0 }
  0xea   :  { %v58_v36 = vld [vmem:[%s695_s0 + $0x160] sm:$0xff] }
  0xeb   :  { %248 = vst [vmem:[%s698_s3 + $0xf0] sm:$0xff] %v199_v21  ;;  %v111_v47 = vmul.f32 %v299_v1, %v58_v36 }
  0xed   :  { %v164_v60 = vadd.f32 %v304_v2, %v111_v47 }
  0xef   :  { %v213_v5 = vmax.f32 %v164_v60, 0.0 }
  0xf2   :  { %v59_v40 = vld [vmem:[%s695_s0 + $0x168] sm:$0xff] }
  0xf3   :  { %249 = vst [vmem:[%s698_s3 + $0xf8] sm:$0xff] %v200_v25  ;;  %v112_v51 = vmul.f32 %v299_v1, %v59_v40 }
  0xf5   :  { %v165_v63 = vadd.f32 %v304_v2, %v112_v51 }
  0xf7   :  { %v214_v7 = vmax.f32 %v165_v63, 0.0 }
  0xfa   :  { %v60_v44 = vld [vmem:[%s695_s0 + $0x170] sm:$0xff] }
  0xfb   :  { %250 = vst [vmem:[%s698_s3 + $0x100] sm:$0xff] %v201_v29  ;;  %v113_v55 = vmul.f32 %v299_v1, %v60_v44 }
  0xfd   :  { %v166_v3 = vadd.f32 %v304_v2, %v113_v55 }
  0xff   :  { %v215_v8 = vmax.f32 %v166_v3, 0.0 }
 0x102   :  { %v61_v48 = vld [vmem:[%s695_s0 + $0x178] sm:$0xff] }
 0x103   :  { %251 = vst [vmem:[%s698_s3 + $0x108] sm:$0xff] %v202_v33  ;;  %v114_v58 = vmul.f32 %v299_v1, %v61_v48 }
 0x10a   :  { %v62_v52 = vld [vmem:[%s695_s0 + $0x180] sm:$0xff] }
 0x10b   :  { %252 = vst [vmem:[%s698_s3 + $0x110] sm:$0xff] %v203_v37  ;;  %v115_v61 = vmul.f32 %v299_v1, %v62_v52  ;;  %v167_v1 = vadd.f32 %v304_v2, %v114_v58 }
 0x10c   :  { %253 = vst [vmem:[%s698_s3 + $0x118] sm:$0xff] %v204_v41 }
 0x10d   :  { %254 = vst [vmem:[%s698_s3 + $0x120] sm:$0xff] %v205_v45  ;;  %v168_v6 = vadd.f32 %v304_v2, %v115_v61  ;;  %v216_v9 = vmax.f32 %v167_v1, 0.0 }
 0x10e   :  { %255 = vst [vmem:[%s698_s3 + $0x128] sm:$0xff] %v206_v49 }
 0x10f   :  { %256 = vst [vmem:[%s698_s3 + $0x130] sm:$0xff] %v207_v53  ;;  %v217_v2 = vmax.f32 %v168_v6, 0.0 }
 0x110   :  { %257 = vst [vmem:[%s698_s3 + $0x138] sm:$0xff] %v208_v56 }
 0x111   :  { %258 = vst [vmem:[%s698_s3 + $0x140] sm:$0xff] %v209_v59 }
 0x112   :  { %259 = vst [vmem:[%s698_s3 + $0x148] sm:$0xff] %v210_v62 }
 0x113   :  { %260 = vst [vmem:[%s698_s3 + $0x150] sm:$0xff] %v211_v0 }
 0x114   :  { %261 = vst [vmem:[%s698_s3 + $0x158] sm:$0xff] %v212_v4 }
 0x115   :  { %262 = vst [vmem:[%s698_s3 + $0x160] sm:$0xff] %v213_v5 }
 0x116   :  { %263 = vst [vmem:[%s698_s3 + $0x168] sm:$0xff] %v214_v7 }
 0x117   :  { %264 = vst [vmem:[%s698_s3 + $0x170] sm:$0xff] %v215_v8 }
 0x118   :  { %265 = vst [vmem:[%s698_s3 + $0x178] sm:$0xff] %v216_v9 }
 0x119   :  { %266 = vst [vmem:[%s698_s3 + $0x180] sm:$0xff] %v217_v2 }

// kernel: conv_bn_relu.2
= control target key start
LH: loop header
LB: loop body
LE: loop exit
PB: predicated region body
PF: predicated region fallthrough
CT: control target
= control target key end

     0   :  { %vm613_vm0 = vcmask 1040384   ;;  %s1287_s1 = inlined_call_operand.vmem [shape: bf16[128,128], index: 1, kind: input, shape index: {}]   ;;  %s1288_s0 = inlined_call_operand.vmem [shape: bf16[392,128], index: 0, kind: input, shape index: {}]   ;;  %s1289_s2 = inlined_call_operand.vmem [shape: f32[392,128], index: 2, kind: output, shape index: {0}]   ;;  %s1290_s3 = inlined_call_operand.vmem [shape: f32[1,2,128], index: 3, kind: output, shape index: {1}]  }
   0x1   :  { %v783_v0 = vld [vmem:[%s1287_s1 + $0x38] sm:$0xff]  ;;  %v782_v1 = vld [vmem:[%s1287_s1 + $0x30] sm:$0xff]  ;;  %v781_v2 = vld [vmem:[%s1287_s1 + $0x28] sm:$0xff] }
   0x2   :  { %274 = vmatpush.bf16.msra.mxu0 %v783_v0  ;;  %784 = vmatpush.bf16.msra.mxu1 %v783_v0  ;;  %v780_v3 = vld [vmem:[%s1287_s1 + $0x20] sm:$0xff]  ;;  %v779_v4 = vld [vmem:[%s1287_s1 + $0x18] sm:$0xff]  ;;  %v778_v5 = vld [vmem:[%s1287_s1 + $0x10] sm:$0xff] }
   0x3   :  { %785 = vmatpush.bf16.msra.mxu2 %v783_v0  ;;  %786 = vmatpush.bf16.msra.mxu3 %v783_v0  ;;  %v777_v6 = vld [vmem:[%s1287_s1 + $0x8] sm:$0xff]  ;;  %v776_v7 = vld [vmem:[%s1287_s1] sm:$0xff]  ;;  %v758_v9 = vld [vmem:[%s1288_s0 + $0x30] sm:$0xff] }
   0x4   :  { %v752_v8 = vld [vmem:[%s1288_s0] sm:$0xff]  ;;  %v753_v11 = vld [vmem:[%s1288_s0 + $0x8] sm:$0xff]  ;;  %v759_v12 = vld [vmem:[%s1288_s0 + $0x38] sm:$0xff] }
   0x5   :  { %v764_v10 = vld [vmem:[%s1288_s0 + $0x60] sm:$0xff]  ;;  %v765_v13 = vld [vmem:[%s1288_s0 + $0x68] sm:$0xff]  ;;  %v754_v14 = vld [vmem:[%s1288_s0 + $0x10] sm:$0xff] }
   0x6   :  { %275 = vmatpush.bf16.msra.mxu0 %v782_v1  ;;  %787 = vmatpush.bf16.msra.mxu1 %v782_v1  ;;  %v760_v15 = vld [vmem:[%s1288_s0 + $0x40] sm:$0xff]  ;;  %v766_v16 = vld [vmem:[%s1288_s0 + $0x70] sm:$0xff]  ;;  %v771_v17 = vld [vmem:[%s1288_s0 + $0x98] sm:$0xff] }
   0x7   :  { %788 = vmatpush.bf16.msra.mxu2 %v782_v1  ;;  %789 = vmatpush.bf16.msra.mxu3 %v782_v1  ;;  %v755_v18 = vld [vmem:[%s1288_s0 + $0x18] sm:$0xff]  ;;  %v761_v19 = vld [vmem:[%s1288_s0 + $0x48] sm:$0xff]  ;;  %v772_v21 = vld [vmem:[%s1288_s0 + $0xa0] sm:$0xff] }
   0x8   :  { %v767_v20 = vld [vmem:[%s1288_s0 + $0x78] sm:$0xff]  ;;  %v756_v22 = vld [vmem:[%s1288_s0 + $0x20] sm:$0xff]  ;;  %v762_v23 = vld [vmem:[%s1288_s0 + $0x50] sm:$0xff] }
   0x9   :  { %v768_v24 = vld [vmem:[%s1288_s0 + $0x80] sm:$0xff]  ;;  %v773_v25 = vld [vmem:[%s1288_s0 + $0xa8] sm:$0xff]  ;;  %v763_v27 = vld [vmem:[%s1288_s0 + $0x58] sm:$0xff] }
   0xa   :  { %276 = vmatpush.bf16.msra.mxu0 %v781_v2  ;;  %790 = vmatpush.bf16.msra.mxu1 %v781_v2  ;;  %v757_v26 = vld [vmem:[%s1288_s0 + $0x28] sm:$0xff]  ;;  %v774_v29 = vld [vmem:[%s1288_s0 + $0xb0] sm:$0xff]  ;;  %v775_v31 = vld [vmem:[%s1288_s0 + $0xb8] sm:$0xff] }
   0xb   :  { %791 = vmatpush.bf16.msra.mxu2 %v781_v2  ;;  %792 = vmatpush.bf16.msra.mxu3 %v781_v2  ;;  %v769_v28 = vld [vmem:[%s1288_s0 + $0x88] sm:$0xff]  ;;  %v770_v30 = vld [vmem:[%s1288_s0 + $0x90] sm:$0xff]  ;;  %v61_v32 = vld [vmem:[%s1288_s0 + $0xc0] sm:$0xf] }
   0xc   :  { %v175_v33 = vunpack.c.l.b16 %v61_v32 }
   0xe   :  { %277 = vmatpush.bf16.msra.mxu0 %v780_v3  ;;  %793 = vmatpush.bf16.msra.mxu1 %v780_v3  ;;  %v200_v34 = vpack.c.b16 %v175_v33, %v175_v33 }
   0xf   :  { %794 = vmatpush.bf16.msra.mxu2 %v780_v3  ;;  %795 = vmatpush.bf16.msra.mxu3 %v780_v3 }
  0x12   :  { %278 = vmatpush.bf16.msra.mxu0 %v779_v4  ;;  %796 = vmatpush.bf16.msra.mxu1 %v779_v4 }
  0x13   :  { %797 = vmatpush.bf16.msra.mxu2 %v779_v4  ;;  %798 = vmatpush.bf16.msra.mxu3 %v779_v4 }
  0x16   :  { %279 = vmatpush.bf16.msra.mxu0 %v778_v5  ;;  %799 = vmatpush.bf16.msra.mxu1 %v778_v5 }
  0x17   :  { %800 = vmatpush.bf16.msra.mxu2 %v778_v5  ;;  %801 = vmatpush.bf16.msra.mxu3 %v778_v5 }
  0x1a   :  { %280 = vmatpush.bf16.msra.mxu0 %v777_v6  ;;  %802 = vmatpush.bf16.msra.mxu1 %v777_v6 }
  0x1b   :  { %803 = vmatpush.bf16.msra.mxu2 %v777_v6  ;;  %804 = vmatpush.bf16.msra.mxu3 %v777_v6 }
  0x1e   :  { %281 = vmatpush.bf16.msra.mxu0 %v776_v7  ;;  %805 = vmatpush.bf16.msra.mxu1 %v776_v7 }
  0x1f   :  { %806 = vmatpush.bf16.msra.mxu2 %v776_v7  ;;  %807 = vmatpush.bf16.msra.mxu3 %v776_v7 }
  0x21   :  { %282 = vmatmul.bf16.vlgmr.msra.gmra.mxu0 %v752_v8  ;;  %312 = vmatmul.bf16.vlgmr.msra.gmra.mxu1 %v758_v9 }
  0x22   :  { %342 = vmatmul.bf16.vlgmr.msra.gmra.mxu2 %v764_v10  ;;  %377 = vmatmul.bf16.vlgmr.msra.gmra.mxu3 %v771_v17 }
  0x31   :  { %287 = vmatmul.bf16.gmra.mxu0 %v753_v11  ;;  %317 = vmatmul.bf16.gmra.mxu1 %v759_v12 }
  0x32   :  { %347 = vmatmul.bf16.gmra.mxu2 %v765_v13  ;;  %382 = vmatmul.bf16.gmra.mxu3 %v772_v21 }
  0x41   :  { %292 = vmatmul.bf16.gmra.mxu0 %v754_v14  ;;  %322 = vmatmul.bf16.gmra.mxu1 %v760_v15 }
  0x42   :  { %352 = vmatmul.bf16.gmra.mxu2 %v766_v16  ;;  %387 = vmatmul.bf16.gmra.mxu3 %v773_v25 }
  0x51   :  { %297 = vmatmul.bf16.gmra.mxu0 %v755_v18  ;;  %327 = vmatmul.bf16.gmra.mxu1 %v761_v19 }
  0x52   :  { %357 = vmatmul.bf16.gmra.mxu2 %v767_v20  ;;  %392 = vmatmul.bf16.gmra.mxu3 %v774_v29 }
  0x61   :  { %302 = vmatmul.bf16.gmra.mxu0 %v756_v22  ;;  %332 = vmatmul.bf16.gmra.mxu1 %v762_v23 }
  0x62   :  { %362 = vmatmul.bf16.gmra.mxu2 %v768_v24  ;;  %397 = vmatmul.bf16.gmra.mxu3 %v775_v31 }
  0x71   :  { %307 = vmatmul.bf16.gmra.mxu0 %v757_v26  ;;  %337 = vmatmul.bf16.gmra.mxu1 %v763_v27 }
  0x72   :  { %367 = vmatmul.bf16.gmra.mxu2 %v769_v28  ;;  %402 = vmatmul.bf16.gmra.mxu3 %v200_v34 }
  0x82   :  { %372 = vmatmul.bf16.gmra.mxu2 %v770_v30 }
  0x9e   :  { %v283_v35 = vpop.f32.mrf.mxu0  ;;  %v927_v36 = vpop.f32.mrf.mxu1 }
  0x9f   :  { %407 = vst [vmem:[%s1289_s2] sm:$0xff] %v283_v35  ;;  %v510_v2 = vmul.f32 %v283_v35, %v283_v35 }
  0xa0   :  { %419 = vst [vmem:[%s1289_s2 + $0x60] sm:$0xff] %v927_v36 }
  0xa5   :  { %v936_v37 = vpop.f32.mrf.mxu2  ;;  %v1011_v52 = vpop.f32.mrf.mxu3 }
  0xa6   :  { %v285_v38 = vpop.f32.mrf.mxu0  ;;  %v938_v39 = vpop.f32.mrf.mxu1  ;;  %431 = vst [vmem:[%s1289_s2 + $0xc0] sm:$0xff] %v936_v37 }
  0xa7   :  { %408 = vst [vmem:[%s1289_s2 + $0x8] sm:$0xff] %v285_v38  ;;  %v511_v1 = vmul.f32 %v285_v38, %v285_v38  ;;  %v456_v3 = vadd.f32 %v285_v38, %v283_v35 }
  0xa8   :  { %420 = vst [vmem:[%s1289_s2 + $0x68] sm:$0xff] %v938_v39 }
  0xa9   :  { %445 = vst [vmem:[%s1289_s2 + $0x130] sm:$0xff] %v1011_v52  ;;  %v559_v5 = vadd.f32 %v511_v1, %v510_v2 }
  0xad   :  { %v951_v40 = vpop.f32.mrf.mxu2  ;;  %v1032_v56 = vpop.f32.mrf.mxu3 }
  0xae   :  { %v288_v41 = vpop.f32.mrf.mxu0  ;;  %v953_v42 = vpop.f32.mrf.mxu1  ;;  %432 = vst [vmem:[%s1289_s2 + $0xc8] sm:$0xff] %v951_v40 }
  0xaf   :  { %409 = vst [vmem:[%s1289_s2 + $0x10] sm:$0xff] %v288_v41  ;;  %v512_v4 = vmul.f32 %v288_v41, %v288_v41  ;;  %v457_v6 = vadd.f32 %v456_v3, %v288_v41  ;;  %v522_v3 = vmul.f32 %v927_v36, %v927_v36 }
  0xb0   :  { %421 = vst [vmem:[%s1289_s2 + $0x70] sm:$0xff] %v953_v42 }
  0xb1   :  { %446 = vst [vmem:[%s1289_s2 + $0x138] sm:$0xff] %v1032_v56  ;;  %v560_v11 = vadd.f32 %v559_v5, %v512_v4 }
  0xb5   :  { %v966_v43 = vpop.f32.mrf.mxu2  ;;  %v1053_v60 = vpop.f32.mrf.mxu3 }
  0xb6   :  { %v290_v44 = vpop.f32.mrf.mxu0  ;;  %v968_v45 = vpop.f32.mrf.mxu1  ;;  %433 = vst [vmem:[%s1289_s2 + $0xd0] sm:$0xff] %v966_v43 }
  0xb7   :  { %410 = vst [vmem:[%s1289_s2 + $0x18] sm:$0xff] %v290_v44  ;;  %v513_v7 = vmul.f32 %v290_v44, %v290_v44  ;;  %v458_v12 = vadd.f32 %v457_v6, %v290_v44  ;;  %v523_v6 = vmul.f32 %v938_v39, %v938_v39 }
  0xb8   :  { %422 = vst [vmem:[%s1289_s2 + $0x78] sm:$0xff] %v968_v45 }
  0xb9   :  { %447 = vst [vmem:[%s1289_s2 + $0x140] sm:$0xff] %v1053_v60  ;;  %v561_v15 = vadd.f32 %v560_v11, %v513_v7  ;;  %v524_v11 = vmul.f32 %v953_v42, %v953_v42 }
  0xbd   :  { %v981_v46 = vpop.f32.mrf.mxu2  ;;  %v1074_v0 = vpop.f32.mrf.mxu3 }
  0xbe   :  { %v293_v47 = vpop.f32.mrf.mxu0  ;;  %v983_v48 = vpop.f32.mrf.mxu1  ;;  %434 = vst [vmem:[%s1289_s2 + $0xd8] sm:$0xff] %v981_v46 }
  0xbf   :  { %411 = vst [vmem:[%s1289_s2 + $0x20] sm:$0xff] %v293_v47  ;;  %v514_v13 = vmul.f32 %v293_v47, %v293_v47  ;;  %v459_v16 = vadd.f32 %v458_v12, %v293_v47 }
  0xc0   :  { %423 = vst [vmem:[%s1289_s2 + $0x80] sm:$0xff] %v983_v48 }
  0xc1   :  { %448 = vst [vmem:[%s1289_s2 + $0x148] sm:$0xff] %v1074_v0  ;;  %v562_v18 = vadd.f32 %v561_v15, %v514_v13 }
  0xc5   :  { %v996_v49 = vpop.f32.mrf.mxu2  ;;  %v1095_v14 = vpop.f32.mrf.mxu3 }
  0xc6   :  { %v295_v50 = vpop.f32.mrf.mxu0  ;;  %v998_v51 = vpop.f32.mrf.mxu1  ;;  %435 = vst [vmem:[%s1289_s2 + $0xe0] sm:$0xff] %v996_v49 }
  0xc7   :  { %412 = vst [vmem:[%s1289_s2 + $0x28] sm:$0xff] %v295_v50  ;;  %v515_v17 = vmul.f32 %v295_v50, %v295_v50  ;;  %v460_v19 = vadd.f32 %v459_v16, %v295_v50 }
  0xc8   :  { %424 = vst [vmem:[%s1289_s2 + $0x88] sm:$0xff] %v998_v51 }
  0xc9   :  { %449 = vst [vmem:[%s1289_s2 + $0x150] sm:$0xff] %v1095_v14  ;;  %v563_v21 = vadd.f32 %v562_v18, %v515_v17  ;;  %v526_v18 = vmul.f32 %v983_v48, %v983_v48 }
  0xcd   :  { %v1017_v53 = vpop.f32.mrf.mxu2  ;;  %v1116_v30 = vpop.f32.mrf.mxu3 }
  0xce   :  { %v298_v54 = vpop.f32.mrf.mxu0  ;;  %v1019_v55 = vpop.f32.mrf.mxu1  ;;  %436 = vst [vmem:[%s1289_s2 + $0xe8] sm:$0xff] %v1017_v53 }
  0xcf   :  { %413 = vst [vmem:[%s1289_s2 + $0x30] sm:$0xff] %v298_v54  ;;  %v516_v20 = vmul.f32 %v298_v54, %v298_v54  ;;  %v461_v22 = vadd.f32 %v460_v19, %v298_v54 }
  0xd0   :  { %425 = vst [vmem:[%s1289_s2 + $0x90] sm:$0xff] %v1019_v55 }
  0xd1   :  { %v564_v27 = vadd.f32 %v563_v21, %v516_v20  ;;  %450 = vst [vmem:[%s1289_s2 + $0x158] sm:$0xff] %v1116_v30  ;;  %v527_v20 = vmul.f32 %v998_v51, %v998_v51 }
  0xd5   :  { %v1038_v57 = vpop.f32.mrf.mxu2  ;;  %v1134_v2 = vpop.f32.mrf.mxu3 }
  0xd6   :  { %v300_v58 = vpop.f32.mrf.mxu0  ;;  %v1040_v59 = vpop.f32.mrf.mxu1  ;;  %437 = vst [vmem:[%s1289_s2 + $0xf0] sm:$0xff] %v1038_v57 }
  0xd7   :  { %414 = vst [vmem:[%s1289_s2 + $0x38] sm:$0xff] %v300_v58  ;;  %v517_v23 = vmul.f32 %v300_v58, %v300_v58  ;;  %v462_v28 = vadd.f32 %v461_v22, %v300_v58  ;;  %v528_v22 = vmul.f32 %v1019_v55, %v1019_v55 }
  0xd8   :  { %426 = vst [vmem:[%s1289_s2 + $0x98] sm:$0xff] %v1040_v59 }
  0xd9   :  { %v565_v31 = vadd.f32 %v564_v27, %v517_v23  ;;  %451 = vst [vmem:[%s1289_s2 + $0x160] sm:$0xff] %v1134_v2 }
  0xdd   :  { %v1059_v61 = vpop.f32.mrf.mxu2  ;;  %v1158_v17 = vpop.f32.mrf.mxu3 }
  0xde   :  { %v303_v62 = vpop.f32.mrf.mxu0  ;;  %v1061_v63 = vpop.f32.mrf.mxu1  ;;  %438 = vst [vmem:[%s1289_s2 + $0xf8] sm:$0xff] %v1059_v61 }
  0xdf   :  { %415 = vst [vmem:[%s1289_s2 + $0x40] sm:$0xff] %v303_v62  ;;  %v518_v29 = vmul.f32 %v303_v62, %v303_v62  ;;  %v463_v32 = vadd.f32 %v462_v28, %v303_v62 }
  0xe0   :  { %427 = vst [vmem:[%s1289_s2 + $0xa0] sm:$0xff] %v1061_v63 }
  0xe1   :  { %v566_v34 = vadd.f32 %v565_v31, %v518_v29  ;;  %452 = vst [vmem:[%s1289_s2 + $0x168] sm:$0xff] %v1158_v17  ;;  %v530_v31 = vmul.f32 %v1061_v63, %v1061_v63 }
  0xe5   :  { %v1080_v8 = vpop.f32.mrf.mxu2 }
  0xe6   :  { %v305_v9 = vpop.f32.mrf.mxu0  ;;  %v1082_v10 = vpop.f32.mrf.mxu1  ;;  %439 = vst [vmem:[%s1289_s2 + $0x100] sm:$0xff] %v1080_v8 }
  0xe7   :  { %416 = vst [vmem:[%s1289_s2 + $0x48] sm:$0xff] %v305_v9  ;;  %v519_v33 = vmul.f32 %v305_v9, %v305_v9  ;;  %v464_v35 = vadd.f32 %v463_v32, %v305_v9 }
  0xe8   :  { %428 = vst [vmem:[%s1289_s2 + $0xa8] sm:$0xff] %v1082_v10 }
  0xe9   :  { %v567_v41 = vadd.f32 %v566_v34, %v519_v33  ;;  %v531_v34 = vmul.f32 %v1082_v10, %v1082_v10 }
  0xed   :  { %v1101_v24 = vpop.f32.mrf.mxu2 }
  0xee   :  { %v308_v25 = vpop.f32.mrf.mxu0  ;;  %v1103_v26 = vpop.f32.mrf.mxu1  ;;  %440 = vst [vmem:[%s1289_s2 + $0x108] sm:$0xff] %v1101_v24 }
  0xef   :  { %417 = vst [vmem:[%s1289_s2 + $0x50] sm:$0xff] %v308_v25  ;;  %v520_v38 = vmul.f32 %v308_v25, %v308_v25  ;;  %v465_v44 = vadd.f32 %v464_v35, %v308_v25 }
  0xf0   :  { %429 = vst [vmem:[%s1289_s2 + $0xb0] sm:$0xff] %v1103_v26 }
  0xf1   :  { %v568_v58 = vadd.f32 %v567_v41, %v520_v38  ;;  %v532_v41 = vmul.f32 %v1103_v26, %v1103_v26 }
  0xf5   :  { %v1122_v47 = vpop.f32.mrf.mxu2 }
  0xf6   :  { %v310_v50 = vpop.f32.mrf.mxu0  ;;  %v340_v54 = vpop.f32.mrf.mxu1  ;;  %441 = vst [vmem:[%s1289_s2 + $0x110] sm:$0xff] %v1122_v47 }
  0xf7   :  { %418 = vst [vmem:[%s1289_s2 + $0x58] sm:$0xff] %v310_v50  ;;  %v466_v62 = vadd.f32 %v465_v44, %v310_v50  ;;  %v521_v1 = vmul.f32 %v310_v50, %v310_v50 }
  0xf8   :  { %430 = vst [vmem:[%s1289_s2 + $0xb8] sm:$0xff] %v340_v54 }
  0xf9   :  { %v467_v4 = vadd.f32 %v466_v62, %v927_v36  ;;  %v569_v5 = vadd.f32 %v568_v58, %v521_v1  ;;  %v525_v36 = vmul.f32 %v968_v45, %v968_v45  ;;  %v533_v58 = vmul.f32 %v340_v54, %v340_v54 }
  0xfb   :  { %v468_v7 = vadd.f32 %v467_v4, %v938_v39  ;;  %v570_v9 = vadd.f32 %v569_v5, %v522_v3 }
  0xfd   :  { %v469_v12 = vadd.f32 %v468_v7, %v953_v42  ;;  %v571_v13 = vadd.f32 %v570_v9, %v523_v6  ;;  %v1149_v15 = vpop.f32.mrf.mxu2 }
  0xfe   :  { %442 = vst [vmem:[%s1289_s2 + $0x118] sm:$0xff] %v1149_v15 }
  0xff   :  { %v470_v16 = vadd.f32 %v469_v12, %v968_v45  ;;  %v572_v39 = vadd.f32 %v571_v13, %v524_v11  ;;  %v538_v13 = vmul.f32 %v996_v49, %v996_v49 }
 0x101   :  { %v471_v42 = vadd.f32 %v470_v16, %v983_v48  ;;  %v573_v19 = vadd.f32 %v572_v39, %v525_v36  ;;  %v529_v48 = vmul.f32 %v1040_v59, %v1040_v59  ;;  %v540_v39 = vmul.f32 %v1038_v57, %v1038_v57 }
 0x103   :  { %v574_v21 = vadd.f32 %v573_v19, %v526_v18  ;;  %v472_v45 = vadd.f32 %v471_v42, %v998_v51  ;;  %v1182_v51 = vpop.f32.mrf.mxu3 }
 0x104   :  { %453 = vst [vmem:[%s1289_s2 + $0x170] sm:$0xff] %v1182_v51 }
 0x105   :  { %v473_v23 = vadd.f32 %v472_v45, %v1019_v55  ;;  %v575_v25 = vadd.f32 %v574_v21, %v527_v20  ;;  %v1173_v27 = vpop.f32.mrf.mxu2  ;;  %v542_v45 = vmul.f32 %v1080_v8, %v1080_v8 }
 0x106   :  { %443 = vst [vmem:[%s1289_s2 + $0x120] sm:$0xff] %v1173_v27 }
 0x107   :  { %v474_v28 = vadd.f32 %v473_v23, %v1040_v59  ;;  %v576_v29 = vadd.f32 %v575_v25, %v528_v22 }
 0x109   :  { %v475_v55 = vadd.f32 %v474_v28, %v1061_v63  ;;  %v577_v32 = vadd.f32 %v576_v29, %v529_v48  ;;  %v544_v28 = vmul.f32 %v1122_v47, %v1122_v47 }
 0x10b   :  { %v476_v33 = vadd.f32 %v475_v55, %v1082_v10  ;;  %v578_v59 = vadd.f32 %v577_v32, %v530_v31  ;;  %v1200_v62 = vpop.f32.mrf.mxu3  ;;  %v534_v10 = vmul.f32 %v936_v37, %v936_v37  ;;  %v545_v55 = vmul.f32 %v1149_v15, %v1149_v15 }
 0x10c   :  { %454 = vst [vmem:[%s1289_s2 + $0x178] sm:$0xff] %v1200_v62 }
 0x10d   :  { %v579_v35 = vadd.f32 %v578_v59, %v531_v34  ;;  %v477_v38 = vadd.f32 %v476_v33, %v1103_v26  ;;  %v375_v44 = vpop.f32.mrf.mxu2  ;;  %v535_v26 = vmul.f32 %v951_v40, %v951_v40  ;;  %v546_v33 = vmul.f32 %v1173_v27, %v1173_v27 }
 0x10e   :  { %444 = vst [vmem:[%s1289_s2 + $0x128] sm:$0xff] %v375_v44  ;;  %v547_v59 = vmul.f32 %v375_v44, %v375_v44 }
 0x10f   :  { %v580_v63 = vadd.f32 %v579_v35, %v532_v41  ;;  %v478_v50 = vadd.f32 %v477_v38, %v340_v54  ;;  %v536_v54 = vmul.f32 %v966_v43, %v966_v43  ;;  %v548_v35 = vmul.f32 %v1011_v52, %v1011_v52 }
 0x110   :  { %v549_v41 = vmul.f32 %v1032_v56, %v1032_v56 }
 0x111   :  { %v479_v1 = vadd.f32 %v478_v50, %v936_v37  ;;  %v581_v3 = vadd.f32 %v580_v63, %v533_v58  ;;  %v537_v37 = vmul.f32 %v981_v46, %v981_v46  ;;  %v550_v50 = vmul.f32 %v1053_v60, %v1053_v60 }
 0x113   :  { %v480_v4 = vadd.f32 %v479_v1, %v951_v40  ;;  %v582_v5 = vadd.f32 %v581_v3, %v534_v10  ;;  %v1218_v12 = vpop.f32.mrf.mxu3 }
 0x114   :  { %455 = vst [vmem:[%s1289_s2 + $0x180] sm:$0xff] %v1218_v12 }
 0x115   :  { %v481_v6 = vadd.f32 %v480_v4, %v966_v43  ;;  %v583_v7 = vadd.f32 %v582_v5, %v535_v26  ;;  %v539_v43 = vmul.f32 %v1017_v53, %v1017_v53 }
 0x117   :  { %v482_v9 = vadd.f32 %v481_v6, %v981_v46  ;;  %v584_v11 = vadd.f32 %v583_v7, %v536_v54 }
 0x119   :  { %v483_v40 = vadd.f32 %v482_v9, %v996_v49  ;;  %v585_v36 = vadd.f32 %v584_v11, %v537_v37  ;;  %v541_v49 = vmul.f32 %v1059_v61, %v1059_v61  ;;  %v556_v9 = vmul.f32 %v1182_v51, %v1182_v51 }
 0x11b   :  { %v586_v16 = vadd.f32 %v585_v36, %v538_v13  ;;  %v484_v46 = vadd.f32 %v483_v40, %v1017_v53  ;;  %v405_v21 = vpop.f32.mrf.mxu3  ;;  %v543_v53 = vmul.f32 %v1101_v24, %v1101_v24  ;;  %v557_v40 = vmul.f32 %v1200_v62, %v1200_v62 }
 0x11d   :  { %v485_v18 = vadd.f32 %v484_v46, %v1038_v57  ;;  %v587_v42 = vadd.f32 %v586_v16, %v539_v43 }
 0x11f   :  { %v486_v19 = vadd.f32 %v485_v18, %v1059_v61  ;;  %v588_v20 = vadd.f32 %v587_v42, %v540_v39 }
 0x121   :  { %v487_v22 = vadd.f32 %v486_v19, %v1080_v8  ;;  %v589_v23 = vadd.f32 %v588_v20, %v541_v49 }
 0x123   :  { %v488_v25 = vadd.f32 %v487_v22, %v1101_v24  ;;  %v590_v57 = vadd.f32 %v589_v23, %v542_v45 }
 0x125   :  { %v489_v48 = vadd.f32 %v488_v25, %v1122_v47  ;;  %v591_v61 = vadd.f32 %v590_v57, %v543_v53 }
 0x127   :  { %v592_v29 = vadd.f32 %v591_v61, %v544_v28  ;;  %v490_v31 = vadd.f32 %v489_v48, %v1149_v15 }
 0x129   :  { %v593_v8 = vadd.f32 %v592_v29, %v545_v55  ;;  %v491_v32 = vadd.f32 %v490_v31, %v1173_v27 }
 0x12b   :  { %v594_v24 = vadd.f32 %v593_v8, %v546_v33  ;;  %v492_v34 = vadd.f32 %v491_v32, %v375_v44  ;;  %v551_v44 = vmul.f32 %v1074_v0, %v1074_v0 }
 0x12d   :  { %v493_v47 = vadd.f32 %v492_v34, %v1011_v52  ;;  %v595_v38 = vadd.f32 %v594_v24, %v547_v59  ;;  %v552_v52 = vmul.f32 %v1095_v14, %v1095_v14 }
 0x12f   :  { %v494_v15 = vadd.f32 %v493_v47, %v1032_v56  ;;  %v596_v63 = vadd.f32 %v595_v38, %v548_v35  ;;  %v553_v56 = vmul.f32 %v1116_v30, %v1116_v30 }
 0x131   :  { %v495_v27 = vadd.f32 %v494_v15, %v1053_v60  ;;  %v597_v58 = vadd.f32 %v596_v63, %v549_v41  ;;  %v554_v60 = vmul.f32 %v1134_v2, %v1134_v2 }
 0x133   :  { %v496_v10 = vadd.f32 %v495_v27, %v1074_v0  ;;  %v598_v1 = vadd.f32 %v597_v58, %v550_v50  ;;  %v555_v0 = vmul.f32 %v1158_v17, %v1158_v17 }
 0x135   :  { %v599_v3 = vadd.f32 %v598_v1, %v551_v44  ;;  %v497_v26 = vadd.f32 %v496_v10, %v1095_v14 }
 0x137   :  { %v498_v4 = vadd.f32 %v497_v26, %v1116_v30  ;;  %v600_v5 = vadd.f32 %v599_v3, %v552_v52 }
 0x139   :  { %v499_v54 = vadd.f32 %v498_v4, %v1134_v2  ;;  %v601_v6 = vadd.f32 %v600_v5, %v553_v56  ;;  %v558_v2 = vmul.f32 %v1218_v12, %v1218_v12 }
 0x13b   :  { %v500_v7 = vadd.f32 %v499_v54, %v1158_v17  ;;  %v602_v37 = vadd.f32 %v601_v6, %v554_v60 }
 0x13d   :  { %v501_v14 = vadd.f32 %v500_v7, %v1182_v51  ;;  %v603_v11 = vadd.f32 %v602_v37, %v555_v0 }
 0x13f   :  { %v604_v30 = vadd.f32 %v603_v11, %v556_v9  ;;  %v502_v13 = vadd.f32 %v501_v14, %v1200_v62 }
 0x141   :  { %v605_v36 = vadd.f32 %v604_v30, %v557_v40  ;;  %v503_v43 = vadd.f32 %v502_v13, %v1218_v12 }
 0x143   :  { %v504_v17 = vrot.slane %v503_v43, 4  ;;  %v606_v16 = vadd.f32 %v605_v36, %v558_v2 }
 0x145   :  { %v505_v46 = vadd.f32 %v504_v17, %v503_v43  ;;  %v607_v39 = vrot.slane %v606_v16, 4 }
 0x147   :  { %v506_v18 = vrot.slane %v505_v46, 2  ;;  %v608_v42 = vadd.f32 %v607_v39, %v606_v16 }
 0x149   :  { %v507_v51 = vadd.f32 %v506_v18, %v505_v46  ;;  %v609_v49 = vrot.slane %v608_v42, 2 }
 0x14b   :  { %v508_v19 = vrot.slane %v507_v51, 1  ;;  %v610_v20 = vadd.f32 %v609_v49, %v608_v42 }
 0x14d   :  { %v611_v21 = vrot.slane %v610_v20, 1  ;;  %v509_v45 = vadd.f32 %v508_v19, %v507_v51 }
 0x14f   :  { %v612_v62 = vadd.f32 %v611_v21, %v610_v20 }
 0x151   :  { %v614_v22 = vsel %vm613_vm0, %v509_v45, %v612_v62 }
 0x152   :  { %615 = vst [vmem:[%s1290_s3] sm:$0x3] %v614_v22 }

</bundles_post_ra>
